<compile_context>
chip_gen: v7x
topology: tpu7x:2x2x1
jax: 0.10.0
libtpu: 0.0.40
codegen_flags: <defaults>
</compile_context>

<pallas_src>
import jax
import jax.numpy as jnp
from jax import lax
from jax.experimental import pallas as pl
from jax.experimental.pallas import tpu as pltpu

CLS_MAP_PREFIX = 'cls_map_'

_LANE = 128
_SMALL_INPUT_BYTES = 2 << 20   # below this, a fused XLA reduce beats pallas dispatch


# ---------------------------------------------------------------------------
# Hardware / tiling helpers
# ---------------------------------------------------------------------------
def _tpu_generation():
    try:
        kind = jax.devices()[0].device_kind.lower()
    except Exception:
        return None
    if 'v7' in kind or 'tpu7' in kind:
        return 'v7'
    if 'v6' in kind:
        return 'v6'
    if 'v5' in kind:
        return 'v5'
    return None


def _tpu_info():
    try:
        return pltpu.get_tpu_info()
    except Exception:
        return None


def _block_budget_bytes():
    # Budget for ONE input block. Live VMEM ~= 2x this (double-buffered input) plus a
    # small f32 partial accumulator (the full-block f32 transient is gone, see kernel).
    gen = _tpu_generation()
    if gen == 'v6':
        return 16 << 20     # 128 MiB physical; vmem_limit raised to 96 MiB below
    if gen == 'v7':
        return 8 << 20      # only 64 MiB VMEM per TensorCore on v7x
    if gen == 'v5':
        return 6 << 20      # 128 MiB physical; vmem_limit raised to 64 MiB below
    info = _tpu_info()      # unknown part (v4/v5p/...): derive from hardware query
    if info is not None:
        try:
            return max(2 << 20, int(info.vmem_capacity_bytes) // 16)
        except Exception:
            pass
    return 4 << 20


def _vmem_limit_bytes():
    gen = _tpu_generation()
    if gen == 'v6':
        return 96 << 20
    if gen == 'v7':
        return 48 << 20
    if gen == 'v5':
        return 64 << 20
    info = _tpu_info()
    if info is not None:
        try:
            return int(info.vmem_capacity_bytes) * 3 // 4
        except Exception:
            pass
    return None


def _row_align(itemsize):
    # Sublane packing: f32 -> 8 rows/vreg, bf16 -> 16, int8/fp8 -> 32.
    return 8 * max(1, 4 // max(1, itemsize))


def _pick_tile_rows(R, HW, itemsize, min_steps=2):
    """Largest sublane-aligned row tile that (a) fits the per-generation VMEM budget and
    (b) leaves at least `min_steps` grid steps for pipelining / cross-TC sharding."""
    align = _row_align(itemsize)
    if R <= align:
        return R
    budget = _block_budget_bytes()
    row_bytes = max(1, HW * itemsize)
    tile = max(align, (budget // row_bytes) // align * align)
    if min_steps > 1:
        cap = -(-((R + min_steps - 1) // min_steps) // align) * align   # roundup(cdiv, align)
        tile = min(tile, max(align, cap))
    if tile >= R:
        return R
    if R % tile != 0:
        # Prefer an even divisor of R only if it keeps >= half of the budget tile;
        # otherwise accept a ragged final block (Pallas masks the tail store).
        t = tile
        while t >= max(align, tile // 2):
            if R % t == 0:
                return t
            t -= align
    return tile
    # TODO(synk): if a single row (H*W*itemsize) ever exceeds the budget, an HW-tiled
    # accumulating variant would be needed; not required for video-sized frames.


# ---------------------------------------------------------------------------
# Pallas kernel: row-wise spatial mean (the only HBM-heavy op in the model).
#   x_ref: (TILE_R, HW) in the input dtype (bf16 or f32)
#   o_ref: (TILE_R, 1)  f32
# ---------------------------------------------------------------------------
def _row_mean_kernel(x_ref, o_ref):
    tile_r, hw = x_ref.shape
    inv_hw = 1.0 / hw
    # Lane-chunked accumulation into a narrow f32 partial: avoids a full (tile_r, hw)
    # f32 transient so live VMEM stays ~= the double-buffered input block.
    chunk = 512 if hw % 512 == 0 else (_LANE if hw % _LANE == 0 else 0)
    n_chunks = hw // chunk if chunk else 0
    if n_chunks >= 2:
        def body(c, acc):
            off = pl.multiple_of(c * chunk, chunk)
            return acc + x_ref[:, pl.ds(off, chunk)].astype(jnp.float32)
        acc = lax.fori_loop(0, n_chunks, body,
                            jnp.zeros((tile_r, chunk), jnp.float32),
                            unroll=min(n_chunks, 4))
        o_ref[...] = jnp.sum(acc, axis=-1, keepdims=True) * inv_hw
    else:
        # Small / non-128-multiple HW: direct reduce (f32 transient is tiny here).
        o_ref[...] = jnp.sum(x_ref[...].astype(jnp.float32),
                             axis=-1, keepdims=True) * inv_hw


def spatial_mean_rows(x2d, max_tile_rows=None, force_pallas=False):
    """x2d: (R, HW) -> (R,) f32 row means. Pallas-tiled over rows; tiny inputs fall back
    to a plain (fusable) XLA reduce."""
    R, HW = x2d.shape
    itemsize = x2d.dtype.itemsize

    if not force_pallas and R * HW * itemsize < _SMALL_INPUT_BYTES:
        # Dispatch + a single un-pipelined DMA would cost more than the reduce itself.
        return jnp.mean(x2d.astype(jnp.float32), axis=-1)

    gen = _tpu_generation()
    min_steps = 8 if gen == 'v7' else 2          # v7x: both TCs; others: pipelining
    tile_r = _pick_tile_rows(R, HW, itemsize, min_steps=min_steps)
    if max_tile_rows is not None:
        align = _row_align(itemsize)
        tile_r = min(tile_r, max(align, (max_tile_rows // align) * align))
    n_steps = (R + tile_r - 1) // tile_r

    vmem_limit = _vmem_limit_bytes()

    def call(dim_sem, pipeline_mode):
        if pipeline_mode is not None:
            in_spec = pl.BlockSpec((tile_r, HW), lambda i: (i, 0),
                                   pipeline_mode=pipeline_mode)
        else:
            in_spec = pl.BlockSpec((tile_r, HW), lambda i: (i, 0))
        params = dict(dimension_semantics=(dim_sem,))
        if vmem_limit is not None:
            params['vmem_limit_bytes'] = int(vmem_limit)
        return pl.pallas_call(
            _row_mean_kernel,
            out_shape=jax.ShapeDtypeStruct((R, 1), jnp.float32),
            grid=(n_steps,),
            in_specs=[in_spec],
            # Output is R*4 bytes total, so the sub-128-lane (masked) store is negligible
            # for video-sized HW.
            # TODO(synk): for HW <= ~512 a lane-dense (1, tile_r) output layout would cut
            # masked vst pressure on v5e; skipped to keep lowering simple.
            out_specs=pl.BlockSpec((tile_r, 1), lambda i: (i, 0)),
            compiler_params=pltpu.CompilerParams(**params),
        )(x2d)

    use_core_parallel = (gen == 'v7' and n_steps >= 2)
    lim = vmem_limit if vmem_limit is not None else (32 << 20)
    use_buffered = (n_steps >= 8 and 3 * tile_r * HW * itemsize <= lim // 2)

    if use_core_parallel or use_buffered:
        try:
            dim_sem = pltpu.CORE_PARALLEL if use_core_parallel else "parallel"
            pmode = pl.Buffered(3) if use_buffered else None
            out = call(dim_sem, pmode)
        except Exception:
            out = call("parallel", None)
    else:
        out = call("parallel", None)
    return out[:, 0]


# ---------------------------------------------------------------------------
# BaseModel equivalent
# ---------------------------------------------------------------------------
class BaseModelPallas:
    def __init__(self, num_classes, class_mappings, *, mods=('rgb',),
                 in_channels=4, feat_dim=32, key=None):
        if key is None:
            key = jax.random.PRNGKey(0)
        self.mods = sorted(mods)
        self.num_classes = num_classes
        self.feat_dim = feat_dim
        self.head_order = sorted(num_classes.keys())
        nc_total = sum(num_classes[h] for h in self.head_order)

        keys = jax.random.split(key, 2 * len(self.mods) + 2)
        self.w_bb, self.b_bb = {}, {}
        for i, mod in enumerate(self.mods):
            self.w_bb[mod] = 0.05 * jax.random.normal(
                keys[2 * i], (in_channels, feat_dim), jnp.float32)
            self.b_bb[mod] = 0.01 * jax.random.normal(
                keys[2 * i + 1], (1, feat_dim), jnp.float32)

        d_total = feat_dim * len(self.mods)
        self.w_cls = 0.05 * jax.random.normal(keys[-2], (d_total, nc_total), jnp.float32)
        self.b_cls = 0.01 * jax.random.normal(keys[-1], (1, nc_total), jnp.float32)

        # register class-mapping buffers (unused in forward, as in the reference)
        self.buffers = {}
        for (src, dst), mapping in class_mappings.items():
            self.buffers[f'{CLS_MAP_PREFIX}{src}_{dst}'] = mapping

    # ----- backbone: pooled conv1x1x1 over ALL crops/clips/frames in one kernel call -----
    def _backbone_pool_project(self, mod, data7):
        """data7: (B, clips, crops, C, T, H, W) -> feats (B, clips, crops, T, D)."""
        B, clips, crops, C, T, H, W = data7.shape
        # Free reshape (contiguous, native layout) -> no HBM transpose copy.
        x2d = data7.reshape(B * clips * crops * C * T, H * W)
        pooled = spatial_mean_rows(x2d)                         # (R,) f32
        pooled = pooled.reshape(B, clips, crops, C, T)
        # Tiny-tensor permute + K=C projection in plain XLA (matches mean->permute->conv).
        pooled = jnp.transpose(pooled, (0, 1, 2, 4, 3))         # (B, clips, crops, T, C)
        feats = pooled @ self.w_bb[mod] + self.b_bb[mod]        # (B, clips, crops, T, D)
        return feats

    # ----- synthetic future predictor + target handling (tiny; plain XLA) -----------------
    def _predict_with_targets(self, feats_past, kwargs):
        target = kwargs['target']
        target_subclips = kwargs['target_subclips']
        target_subclips_ignore_index = kwargs['target_subclips_ignore_index']
        if kwargs.get('mixup_fn') is not None:
            mixup_fn = kwargs['mixup_fn']
            # NOTE: matches the reference call/unpack signature exactly.
            feats_past, target, target_subclips, target_subclips_ignore_index = mixup_fn(
                feats_past, target, target_subclips)

        # TODO(synk): the reference CMFP future predictor is hydra-configured; here it is a
        # synthetic temporal-mean-pool + linear heads over concatenated modality features.
        f_all = jnp.concatenate([feats_past[m] for m in sorted(feats_past)], axis=-1)
        pooled = jnp.mean(f_all.astype(jnp.float32), axis=1)        # (B, D_total)
        logits_all = pooled @ self.w_cls + self.b_cls               # (B, NC_total)

        outputs = {'logits': {}}
        off = 0
        for h in self.head_order:
            nc = self.num_classes[h]
            outputs['logits'][h] = logits_all[:, off:off + nc]
            off += nc

        outputs_target = {
            'target': target,
            'target_subclips': target_subclips,
            'target_subclips_ignore_index': target_subclips_ignore_index,
        }
        return outputs, outputs_target

    # ----- forward_singlecrop (reference-compatible single-crop path) ---------------------
    def forward_singlecrop(self, data_dict, *args, **kwargs):
        feats_past = {}
        for mod, data in data_dict.items():
            B = data.shape[0]
            feats = self._backbone_pool_project(mod, data[:, :, None])   # crops = 1
            # matches: mean([-1,-2]) -> permute(0,1,3,2) -> flatten(1,2)
            feats_past[mod] = feats[:, :, 0].reshape(B, -1, self.feat_dim)
        return self._predict_with_targets(feats_past, kwargs)

    # ----- forward (multi-crop handling + merge) ------------------------------------------
    def forward(self, video_data, *args, **kwargs):
        video_data = dict(video_data)
        # Normalize every modality to (B, clips, crops, C, T, H, W) WITHOUT unbinding the
        # crop axis, so the row-flatten above stays a free reshape (no per-crop HBM copies).
        data7 = {}
        for mod, data in video_data.items():
            if data.ndim == 6:
                data7[mod] = data[:, :, None]
            elif data.ndim == 7:
                data7[mod] = data
            else:
                raise NotImplementedError('Unsupported size %s' % str(data.shape))

        all_mods = sorted(data7.keys())
        num_crops = max(data7[m].shape[2] for m in all_mods)

        # ONE backbone kernel call per modality covering all crops/clips/frames.
        per_crop_feats = [dict() for _ in range(num_crops)]
        for mod in all_mods:
            d7 = data7[mod]
            B, clips, crops = d7.shape[0], d7.shape[1], d7.shape[2]
            if num_crops % crops != 0:
                raise NotImplementedError('Crop counts must divide: %d vs %d'
                                          % (crops, num_crops))
            feats = self._backbone_pool_project(mod, d7)        # (B, clips, crops, T, D)
            for ci in range(num_crops):
                f = feats[:, :, ci % crops]                     # replication == `sl * k`
                per_crop_feats[ci][mod] = f.reshape(B, -1, self.feat_dim)

        feats = [self._predict_with_targets(per_crop_feats[ci], kwargs)
                 for ci in range(num_crops)]
        output_targets = feats[0][1]

        # merge over crops (identical to the reference)
        feats_merged = {}
        for out_dict, _ in feats:
            for key in out_dict:
                if key not in feats_merged:
                    feats_merged[key] = {k: [v] for k, v in out_dict[key].items()}
                else:
                    for k, v in feats_merged[key].items():
                        v.append(out_dict[key][k])
        for out_key in feats_merged:
            if out_key == 'attentions':
                feats_merged[out_key] = {k: el[0] for k, el in feats_merged[out_key].items()}
                continue
            feats_merged[out_key] = {
                k: jnp.mean(jnp.stack(el, axis=0), axis=0)
                for k, el in feats_merged[out_key].items()
            }
        return feats_merged, output_targets


# ---------------------------------------------------------------------------
if __name__ == "__main__":
    key = jax.random.PRNGKey(0)
    kx, km = jax.random.split(key)

    B, clips, crops, C, T, H, W = 2, 2, 2, 4, 8, 16, 16
    feat_dim = 32
    num_classes = {'verb': 12, 'noun': 20}
    class_mappings = {('verb', 'noun'): jnp.zeros((12, 20), jnp.float32)}

    # --- Kernel correctness spot-checks (force the Pallas path) ---------------------------
    # 1) Multi-block grid with a RAGGED final block (1000 % 192 != 0): verifies that the
    #    padded tail input + masked tail store produce exact row means.
    xt = jax.random.normal(jax.random.PRNGKey(1), (1000, 384), jnp.float32).astype(jnp.bfloat16)
    got = jax.block_until_ready(spatial_mean_rows(xt, max_tile_rows=192, force_pallas=True))
    ref = jnp.mean(xt.astype(jnp.float32), axis=-1)
    assert got.shape == (1000,)
    assert jnp.allclose(got, ref, atol=1e-4, rtol=1e-4)

    # 2) f32 input, even-division grid.
    xt2 = jax.random.normal(jax.random.PRNGKey(2), (256, 256), jnp.float32)
    got2 = jax.block_until_ready(spatial_mean_rows(xt2, max_tile_rows=64, force_pallas=True))
    ref2 = jnp.mean(xt2, axis=-1)
    assert jnp.allclose(got2, ref2, atol=1e-4, rtol=1e-4)

    # --- Full model forward (bf16 activations; tiny test slab uses the XLA fallback) ------
    video = jax.random.normal(
        kx, (B, clips, crops, C, T, H, W), jnp.float32).astype(jnp.bfloat16)

    model = BaseModelPallas(num_classes, class_mappings,
                            mods=('rgb',), in_channels=C, feat_dim=feat_dim, key=km)

    target = {h: jnp.zeros((B,), jnp.int32) for h in num_classes}
    outputs, output_targets = model.forward(
        {'rgb': video},
        target=target,
        target_subclips=None,
        target_subclips_ignore_index=None,
        mixup_fn=None,
    )

    for h in model.head_order:
        logits = jax.block_until_ready(outputs['logits'][h])
        assert logits.shape == (B, num_classes[h]), logits.shape
        assert jnp.all(jnp.isfinite(logits))
    print("KERNEL_OK")
</pallas_src>

<mosaic_0001>
module attributes {stable_mosaic.version = 11 : i64} {
  func.func @_row_mean_kernel(%arg0: i32, %arg1: memref<192x384xbf16, #tpu.memory_space<vmem>>, %arg2: memref<192x1xf32, #tpu.memory_space<vmem>>) attributes {dimension_semantics = [#tpu.dimension_semantics<parallel>], iteration_bounds = array<i64: 6>, scalar_prefetch = 0 : i64, scratch_operands = 0 : i64, tpu.core_type = #tpu.core_type<tc>, window_params = [{transform_indices = @transform_0, window_bounds = array<i64: 192, 384>}, {transform_indices = @transform_1, window_bounds = array<i64: 192, 1>}]} {
    %cst = arith.constant 0.000000e+00 : f32
    %0 = vector.broadcast %cst : f32 to vector<192x128xf32>
    %c0_i32 = arith.constant 0 : i32
    %c128_i32 = arith.constant 128 : i32
    %1 = arith.muli %c0_i32, %c128_i32 : i32
    %2 = tpu.assume_multiple %1, 128 : i32
    %c0 = arith.constant 0 : index
    %3 = arith.index_cast %2 : i32 to index
    %4 = vector.load %arg1[%c0, %3] : memref<192x384xbf16, #tpu.memory_space<vmem>>, vector<192x128xbf16>
    %5 = arith.extf %4 : vector<192x128xbf16> to vector<192x128xf32>
    %6 = arith.addf %0, %5 : vector<192x128xf32>
    %c1_i32 = arith.constant 1 : i32
    %c128_i32_0 = arith.constant 128 : i32
    %7 = arith.muli %c1_i32, %c128_i32_0 : i32
    %8 = tpu.assume_multiple %7, 128 : i32
    %c0_1 = arith.constant 0 : index
    %9 = arith.index_cast %8 : i32 to index
    %10 = vector.load %arg1[%c0_1, %9] : memref<192x384xbf16, #tpu.memory_space<vmem>>, vector<192x128xbf16>
    %11 = arith.extf %10 : vector<192x128xbf16> to vector<192x128xf32>
    %12 = arith.addf %6, %11 : vector<192x128xf32>
    %c2_i32 = arith.constant 2 : i32
    %c128_i32_2 = arith.constant 128 : i32
    %13 = arith.muli %c2_i32, %c128_i32_2 : i32
    %14 = tpu.assume_multiple %13, 128 : i32
    %c0_3 = arith.constant 0 : index
    %15 = arith.index_cast %14 : i32 to index
    %16 = vector.load %arg1[%c0_3, %15] : memref<192x384xbf16, #tpu.memory_space<vmem>>, vector<192x128xbf16>
    %17 = arith.extf %16 : vector<192x128xbf16> to vector<192x128xf32>
    %18 = arith.addf %12, %17 : vector<192x128xf32>
    %c3_i32 = arith.constant 3 : i32
    %cst_4 = arith.constant dense<0.000000e+00> : vector<192xf32>
    %19 = vector.multi_reduction <add>, %18, %cst_4 [1] : vector<192x128xf32> to vector<192xf32>
    %20 = vector.shape_cast %19 : vector<192xf32> to vector<192x1xf32>
    %cst_5 = arith.constant 0.00260416674 : f32
    %21 = vector.broadcast %cst_5 : f32 to vector<192x1xf32>
    %22 = arith.mulf %20, %21 : vector<192x1xf32>
    %c0_6 = arith.constant 0 : index
    %c0_7 = arith.constant 0 : index
    %23 = vector.load %arg2[%c0_6, %c0_7] : memref<192x1xf32, #tpu.memory_space<vmem>>, vector<192x1xf32>
    tpu.vector_store %arg2[%c0_6, %c0_7], %22 {strides = array<i32>} : memref<192x1xf32, #tpu.memory_space<vmem>>, vector<192x1xf32>,
    return
  }
  func.func @transform_0(%arg0: i32) -> (i32, i32) {
    %c0_i32 = arith.constant 0 : i32
    %c0_i32_0 = arith.constant 0 : i32
    return %arg0, %c0_i32 : i32, i32
  }
  func.func @transform_1(%arg0: i32) -> (i32, i32) {
    %c0_i32 = arith.constant 0 : i32
    %c0_i32_0 = arith.constant 0 : i32
    return %arg0, %c0_i32 : i32, i32
  }
}

</mosaic_0001>

<bundles_post_ra>
// kernel: tpu_custom_call.1
= control target key start
LH: loop header
LB: loop body
LE: loop exit
PB: predicated region body
PF: predicated region fallthrough
CT: control target
= control target key end

     0   :  { %6 = vsyncpa [#allocation3], 0  ;;  %s1414_s0 = inlined_call_operand.hbm [shape: bf16[1000,384], index: 0, kind: input, shape index: {}]   ;;  %s1415_s1 = inlined_call_operand.vmem [shape: f32[1000,1], index: 1, kind: output, shape index: {}]  }
   0x1   :  { %8 = vsyncpa [#allocation3 + $0x1], 0  ;;  %s1105_s6 = smov 0   ;;  %s1107_s7 = smov 0  }
   0x2   :  { %s1109_s8 = smov 0   ;;  %s1111_s9 = smov 0  }
   0x3 LB: > { %s1124_s10 = sadd.s32 4294967295, %s1058_s9   ;;  %s1127_s11 = sadd.s32 1, %s1058_s9   ;;  %s1058_s9 = sphi %s1111_s9, %s1425_s9   ;;  %s1054_s8 = sphi %s1109_s8, %s1424_s8   ;;  %s1050_s7 = sphi %s1107_s7, %s1423_s7   ;;  %s1046_s6 = sphi %s1105_s6, %s1422_s6  }
   0x4   : > { %s18_s12 = ssub.s32 %s1058_s9, %s1127_s11  ;;  %s21_s13 = sadd.s32 1, %s1054_s8 }
   0x5   : > { %p19_p0 = scmp.eq.s32.totalorder %s18_s12, 0  ;;  %p28_p1 = scmp.ne.s32.totalorder %s1054_s8, %s1050_s7 }
   0x6   : > { %p29_p2 = scmp.eq.s32.totalorder %s1058_s9, 0  ;;  %p34_p3 = scmp.ne.s32.totalorder %s1050_s7, %s1046_s6 }
   0x7   : > { %s1137_s14 = scalar_select %p19_p0, %s1054_s8, %s21_s13  }
   0x8   : > { %p30_p4 = por %p29_p2, %p28_p1  ;;  %p35_p5 = scmp.eq.s32.totalorder %s1124_s10, 0 }
   0x9   : > { %p58_p6 = scmp.eq.s32.totalorder %s1124_s10, 5  ;;  %p787_p9 = scmp.ge.s32.totalorder %s1058_s9, 6 }
   0xa   : > { %p1141_p7 = por %p35_p5, %p34_p3 }
   0xb   : > { %p1145_p8 = por %p58_p6, %p28_p1  ;;  %80 = sbr.rel (%p787_p9) target bundleno = 54 (0x36), region = 16 }
  0x12   : > { %83 = sbr.rel (!%p30_p4) target bundleno = 54 (0x36), region = 20  ;;  %s84_s17 = sand.u32 (%p30_p4), 1, %s1054_s8  }
  0x13   : > { %s89_s18 = smul.u32 (%p30_p4), 24, %s1058_s9  ;;  %s1155_s23 = scalar_lea.sflag (%p30_p4), [#allocation3], %s84_s17 }
  0x14   : > { %s855_s19 = smul.u32 (%p30_p4), 288, %s84_s17 }
  0x15   : > { %s90_s20 = ssub.s32 (%p30_p4), 125, %s89_s18 }
  0x16   : > { %p91_p10 = scmp.lt.s32.totalorder (%p30_p4), %s90_s20, 24  ;;  %s88_s24 = scalar_lea.vmem (%p30_p4), [#allocation2], %s855_s19 }
  0x19   : > { %s1427_s20 = smov (!%p91_p10, %s90_s20), 24 }
  0x1a   : > { %s1152_s21 = smul.u32 192, %s1427_s20 }
  0x1c   : > { %s96_s22 = ssub.s32 4608, %s1152_s21 }
  0x1d   : > { %97 = vsyncadd %s1155_s23, %s96_s22  ;;  %p790_p11 = scmp.ne.s32.totalorder %s1152_s21, 0  ;;  %s860_s25 = smul.u32 4608, %s1058_s9 }
  0x1e   : > { %s103_s26 = sshll.u32 %s88_s24, 4  ;;  %s968_s4 = scalar_lea.hbm %s1414_s0, 24000  ;;  %s1165_s26 = int_to_ptr.vmem [resolvable:$true] %s103_s26 }
  0x1f   : > { %s1163_s29 = scalar_lea.hbm %s1414_s0, %s860_s25 }
  0x20   : > { %s964_s30 = scalar_lea.hbm %s1163_s29, %s1152_s21  ;;  %p969_p1 = scmp.lt.u32.totalorder %s1163_s29, %s1414_s0 }
  0x21   : > { %p965_p12 = scmp.ne.s32.totalorder %s1163_s29, %s964_s30  ;;  %p970_p2 = scmp.lt.u32.totalorder %s968_s4, %s964_s30 }
  0x22   : > { %p972_p4 = scmp.lt.u32.totalorder %s964_s30, %s1163_s29 }
  0x23   : > { %p966_p13 = pnand %p965_p12, %p790_p11  ;;  %p971_p3 = por %p970_p2, %p969_p1 }
  0x25   : > { %p967_p0 = pneg %p966_p13  ;;  %p973_p5 = por %p972_p4, %p971_p3 }
  0x27   : > { %p974_p6 = pnand %p973_p5, %p967_p0 }
  0x29   : > { %977 = shalt.err (!%p974_p6)
}
  0x2a   : > { %s978_s12 = scalar_lea.vmem %s1165_s26, %s1152_s21  ;;  %s1092_s13 = smov [#allocation2]  }
  0x2b   : > { %p979_p9 = scmp.ne.s32.totalorder %s1165_s26, %s978_s12  ;;  %s982_s17 = sshll.u32 %s1092_s13, 4  ;;  %s983_s17 = int_to_ptr.vmem [resolvable:$false] %s982_s17 }
  0x2c   : > { %s984_s18 = scalar_lea.vmem %s983_s17, 9216  ;;  %p985_p13 = scmp.lt.s32.totalorder %s1165_s26, %s983_s17 }
  0x2d   : > { %p980_p10 = pnand %p979_p9, %p790_p11  ;;  %p986_p1 = scmp.lt.s32.totalorder %s984_s18, %s978_s12 }
  0x2f   : > { %p981_p12 = pneg %p980_p10  ;;  %p987_p2 = por %p986_p1, %p985_p13 }
  0x31   : > { %p988_p3 = pnand %p987_p2, %p981_p12 }
  0x33   : > { %991 = shalt.err (!%p988_p3)
}
  0x34   : > { %s1093_s19 = smov 192   ;;  %s1094_s20 = smov 12  }
  0x35   : > { %109 = dma.hbm_to_vmem [thread:$0]  (%p790_p11), %s1163_s29, %s1152_s21, %s1165_s26, %s1155_s23, %s1093_s19, %s1093_s19, %s1094_s20  }
  0x36 PF: > { %p793_p0 = scmp.ge.s32.totalorder %s1058_s9, 1  ;;  %p111_p4 = scmp.lt.s32.totalorder %s1058_s9, 7 }
  0x38   : > { %p112_p5 = pnand %p793_p0, %p111_p4 }
  0x39   : > { %s1195_s22 = sand.u32 (!%p112_p5), 1, %s1050_s7  }
  0x3a   : > { %115 = sbr.rel (%p112_p5) target bundleno = 327 (0x147), region = 24  ;;  %s118_s25 = scalar_lea.sflag (!%p112_p5), [#allocation3], %s1195_s22 }
  0x3b   : > { %s857_s24 = smul.u32 (!%p112_p5), 288, %s1195_s22 }
  0x3d   : > { %s1199_s27 = scalar_lea.vmem (!%p112_p5), [#allocation2], %s857_s24 }
  0x41   : > { %1041 = dma.done.wait (%p1141_p7), %s118_s25, 4608  }
  0x42   : > { %1043 = vsyncadd (%p1141_p7), %s118_s25, 4294962688  ;;  %v152_v0 = vld [vmem:[%s1199_s27 + $0x18] sm:$0xff]   ;;  %v820_v1 = vld [vmem:[%s1199_s27 + $0x20] sm:$0xff]   ;;  %s858_s9 = smul.u32 192, %s1195_s22  ;;  %vm440_vm0 = vcmask 7168  }
  0x43   : > { %v150_v2 = vld [vmem:[%s1199_s27] sm:$0xff]   ;;  %v176_v3 = vunpack.c.l.bf16 %v152_v0  ;;  %v249_v4 = vunpack.c.h.bf16 %v152_v0  ;;  %v322_v5 = vunpack.c.l.bf16 %v820_v1  ;;  %v818_v7 = vld [vmem:[%s1199_s27 + $0x8] sm:$0xff]   ;;  %v795_v9 = vld [vmem:[%s1199_s27 + $0x10] sm:$0xff]   ;;  %v177_v12 = vunpack.c.h.bf16 %v820_v1  ;;  %s472_s21 = smul.u32 (%p1145_p8), 24, %s1124_s10 }
  0x44   : > { %v174_v6 = vunpack.c.l.bf16 %v150_v2  ;;  %v797_v8 = vld [vmem:[%s1199_s27 + $0x28] sm:$0xff]   ;;  %v247_v10 = vunpack.c.h.bf16 %v150_v2  ;;  %v320_v11 = vunpack.c.l.bf16 %v818_v7  ;;  %v155_v14 = vld [vmem:[%s1199_s27 + $0x3c] sm:$0xff]   ;;  %v175_v17 = vunpack.c.h.bf16 %v818_v7  ;;  %v154_v20 = vld [vmem:[%s1199_s27 + $0x30] sm:$0xff]   ;;  %s1246_s15 = scalar_lea.vmem [#allocation4], %s858_s9   ;;  %s854_s23 = smul.u32 (%p1145_p8), 192, %s1124_s10 }
  0x45   : > { %v250_v13 = vunpack.c.l.bf16 %v797_v8  ;;  %v273_v15 = vadd.f32 %v249_v4, %v176_v3  ;;  %v323_v16 = vunpack.c.h.bf16 %v797_v8  ;;  %v248_v18 = vunpack.c.l.bf16 %v795_v9  ;;  %v823_v19 = vld [vmem:[%s1199_s27 + $0x44] sm:$0xff]   ;;  %v157_v25 = vld [vmem:[%s1199_s27 + $0x54] sm:$0xff]   ;;  %v800_v34 = vld [vmem:[%s1199_s27 + $0x4c] sm:$0xff]   ;;  %s473_s26 = ssub.s32 (%p1145_p8), 125, %s472_s21 }
  0x46   : > { %v271_v21 = vadd.f32 %v247_v10, %v174_v6  ;;  %v321_v23 = vunpack.c.h.bf16 %v795_v9  ;;  %v179_v24 = vunpack.c.l.bf16 %v155_v14  ;;  %v252_v28 = vunpack.c.h.bf16 %v155_v14  ;;  %v1216_v29 = vld [vmem:[%s1199_s27 + $0x38] ss:$228 sps:$4 sm:$0xff]   ;;  %v159_v44 = vld [vmem:[%s1199_s27 + $0x6c] sm:$0xff]   ;;  %v802_v46 = vld [vmem:[%s1199_s27 + $0x64] sm:$0xff]   ;;  %p474_p7 = scmp.lt.s32.totalorder (%p1145_p8), %s473_s26, 24  ;;  %s1303_s30 = scalar_lea.vmem (%p1145_p8), %s1415_s1, %s854_s23  }
  0x47   : > { %v274_v22 = vadd.f32 %v250_v13, %v177_v12  ;;  %v346_v26 = vadd.f32 %v322_v5, %v273_v15  ;;  %v272_v27 = vadd.f32 %v248_v18, %v175_v17  ;;  %v325_v31 = vunpack.c.l.bf16 %v823_v19  ;;  %v825_v39 = vld [vmem:[%s1199_s27 + $0x5c] sm:$0xff]   ;;  %v827_v53 = vld [vmem:[%s1199_s27 + $0x74] sm:$0xff]   ;;  %v161_v58 = vld [vmem:[%s1199_s27 + $0x84] sm:$0xff]  }
  0x48   : > { %v344_v30 = vadd.f32 %v320_v11, %v271_v21  ;;  %v178_v32 = vunpack.c.l.bf16 %v154_v20  ;;  %v251_v33 = vunpack.c.h.bf16 %v154_v20  ;;  %v276_v37 = vadd.f32 %v252_v28, %v179_v24  ;;  %v804_v59 = vld [vmem:[%s1199_s27 + $0x7c] sm:$0xff]   ;;  %v829_v5 = vld [vmem:[%s1199_s27 + $0x8c] sm:$0xff]   ;;  %v806_v8 = vld [vmem:[%s1199_s27 + $0x94] sm:$0xff]  }
  0x49   : > { %372 = vadd.xlane.f32.xlu1 %v346_v26  ;;  %v347_v35 = vadd.f32 %v323_v16, %v274_v22  ;;  %v345_v36 = vadd.f32 %v321_v23, %v272_v27  ;;  %v181_v38 = vunpack.c.l.bf16 %v157_v25  ;;  %v324_v41 = vunpack.c.l.bf16 %v1216_v29  ;;  %v163_v2 = vld [vmem:[%s1199_s27 + $0x9c] sm:$0xff]   ;;  %v831_v15 = vld [vmem:[%s1199_s27 + $0xa4] sm:$0xff]   ;;  %v165_v20 = vld [vmem:[%s1199_s27 + $0xb4] sm:$0xff]  }
  0x4a   : > { %368 = vadd.xlane.f32.xlu0 %v344_v30  ;;  %v275_v40 = vadd.f32 %v251_v33, %v178_v32  ;;  %v254_v42 = vunpack.c.h.bf16 %v157_v25  ;;  %v180_v43 = vunpack.c.h.bf16 %v823_v19  ;;  %v253_v45 = vunpack.c.l.bf16 %v800_v34  ;;  %v808_v21 = vld [vmem:[%s1199_s27 + $0xac] sm:$0xff]   ;;  %v833_v28 = vld [vmem:[%s1199_s27 + $0xbc] sm:$0xff]  }
  0x4b   : > { %v349_v47 = vadd.f32 %v325_v31, %v276_v37  ;;  %v327_v48 = vunpack.c.l.bf16 %v825_v39  ;;  %v326_v50 = vunpack.c.h.bf16 %v800_v34  ;;  %v183_v51 = vunpack.c.l.bf16 %v159_v44  ;;  %v167_v34 = vld [vmem:[%s1199_s27 + $0xcc] sm:$0xff]  }
  0x4c   : > { %v278_v49 = vadd.f32 %v254_v42, %v181_v38  ;;  %v256_v52 = vunpack.c.h.bf16 %v159_v44  ;;  %v348_v54 = vadd.f32 %v324_v41, %v275_v40  ;;  %v277_v55 = vadd.f32 %v253_v45, %v180_v43  ;;  %v169_v42 = vld [vmem:[%s1199_s27 + $0xe4] sm:$0xff]   ;;  %v835_v45 = vld [vmem:[%s1199_s27 + $0xd4] sm:$0xff]  }
  0x4d   : > { %374 = vadd.xlane.f32.xlu1 %v347_v35  ;;  %v182_v56 = vunpack.c.h.bf16 %v825_v39  ;;  %v255_v57 = vunpack.c.l.bf16 %v802_v46  ;;  %v329_v60 = vunpack.c.l.bf16 %v827_v53  ;;  %v328_v61 = vunpack.c.h.bf16 %v802_v46  ;;  %v810_v35 = vld [vmem:[%s1199_s27 + $0xc4] sm:$0xff]  }
  0x4e   : > { %370 = vadd.xlane.f32.xlu0 %v345_v36  ;;  %v351_v62 = vadd.f32 %v327_v48, %v278_v49  ;;  %v280_v63 = vadd.f32 %v256_v52, %v183_v51  ;;  %v185_v0 = vunpack.c.l.bf16 %v161_v58  ;;  %v258_v1 = vunpack.c.h.bf16 %v161_v58  ;;  %v812_v48 = vld [vmem:[%s1199_s27 + $0xdc] sm:$0xff]  }
  0x4f   : > { %v350_v3 = vadd.f32 %v326_v50, %v277_v55  ;;  %v279_v4 = vadd.f32 %v255_v57, %v182_v56  ;;  %v184_v6 = vunpack.c.h.bf16 %v827_v53  ;;  %v257_v7 = vunpack.c.l.bf16 %v804_v59  ;;  %v837_v55 = vld [vmem:[%s1199_s27 + $0xec] sm:$0xff]  }
  0x50   : > { %v187_v9 = vunpack.c.l.bf16 %v163_v2  ;;  %v260_v10 = vunpack.c.h.bf16 %v163_v2  ;;  %v353_v11 = vadd.f32 %v329_v60, %v280_v63  ;;  %v282_v12 = vadd.f32 %v258_v1, %v185_v0  ;;  %v171_v60 = vld [vmem:[%s1199_s27 + $0xfc] sm:$0xff]  }
  0x51   : > { %378 = vadd.xlane.f32.xlu1 %v349_v47  ;;  %v331_v13 = vunpack.c.l.bf16 %v829_v5  ;;  %v330_v14 = vunpack.c.h.bf16 %v804_v59  ;;  %v352_v16 = vadd.f32 %v328_v61, %v279_v4  ;;  %v281_v17 = vadd.f32 %v257_v7, %v184_v6  ;;  %v814_v61 = vld [vmem:[%s1199_s27 + $0xf4] sm:$0xff]   ;;  %v839_v4 = vld [vmem:[%s1199_s27 + $0x104] sm:$0xff]  }
  0x52   : > { %376 = vadd.xlane.f32.xlu0 %v348_v54  ;;  %v186_v18 = vunpack.c.h.bf16 %v829_v5  ;;  %v259_v19 = vunpack.c.l.bf16 %v806_v8  ;;  %v284_v22 = vadd.f32 %v260_v10, %v187_v9  ;;  %v333_v23 = vunpack.c.l.bf16 %v831_v15  ;;  %v173_v9 = vld [vmem:[%s1199_s27 + $0x114] sm:$0xff]   ;;  %v816_v10 = vld [vmem:[%s1199_s27 + $0x10c] sm:$0xff]  }
  0x53   : > { %v355_v24 = vadd.f32 %v331_v13, %v282_v12  ;;  %v332_v25 = vunpack.c.h.bf16 %v806_v8  ;;  %v189_v26 = vunpack.c.l.bf16 %v165_v20  ;;  %v262_v27 = vunpack.c.h.bf16 %v165_v20 }
  0x54   : > { %v354_v30 = vadd.f32 %v330_v14, %v281_v17  ;;  %v283_v31 = vadd.f32 %v259_v19, %v186_v18  ;;  %v188_v32 = vunpack.c.h.bf16 %v831_v15  ;;  %v261_v33 = vunpack.c.l.bf16 %v808_v21 }
  0x55   : > { %382 = vadd.xlane.f32.xlu1 %v351_v62  ;;  %v357_v36 = vadd.f32 %v333_v23, %v284_v22  ;;  %v335_v37 = vunpack.c.l.bf16 %v833_v28  ;;  %v286_v38 = vadd.f32 %v262_v27, %v189_v26  ;;  %v334_v39 = vunpack.c.h.bf16 %v808_v21 }
  0x56   : > { %380 = vadd.xlane.f32.xlu0 %v350_v3  ;;  %v191_v40 = vunpack.c.l.bf16 %v167_v34  ;;  %v264_v41 = vunpack.c.h.bf16 %v167_v34  ;;  %v356_v43 = vadd.f32 %v332_v25, %v283_v31  ;;  %v285_v44 = vadd.f32 %v261_v33, %v188_v32 }
  0x57   : > { %v190_v46 = vunpack.c.h.bf16 %v833_v28  ;;  %v263_v47 = vunpack.c.l.bf16 %v810_v35  ;;  %v193_v49 = vunpack.c.l.bf16 %v169_v42  ;;  %v266_v50 = vunpack.c.h.bf16 %v169_v42 }
  0x58   : > { %v359_v51 = vadd.f32 %v335_v37, %v286_v38  ;;  %v288_v52 = vadd.f32 %v264_v41, %v191_v40  ;;  %v337_v53 = vunpack.c.l.bf16 %v835_v45  ;;  %v336_v54 = vunpack.c.h.bf16 %v810_v35 }
  0x59   : > { %386 = vadd.xlane.f32.xlu1 %v353_v11  ;;  %v358_v56 = vadd.f32 %v334_v39, %v285_v44  ;;  %v287_v57 = vadd.f32 %v263_v47, %v190_v46  ;;  %v192_v58 = vunpack.c.h.bf16 %v835_v45  ;;  %v265_v59 = vunpack.c.l.bf16 %v812_v48 }
  0x5a   : > { %384 = vadd.xlane.f32.xlu0 %v352_v16  ;;  %v290_v62 = vadd.f32 %v266_v50, %v193_v49  ;;  %v339_v63 = vunpack.c.l.bf16 %v837_v55  ;;  %v361_v0 = vadd.f32 %v337_v53, %v288_v52  ;;  %v338_v1 = vunpack.c.h.bf16 %v812_v48 }
  0x5b   : > { %v195_v2 = vunpack.c.l.bf16 %v171_v60  ;;  %v268_v3 = vunpack.c.h.bf16 %v171_v60  ;;  %v360_v5 = vadd.f32 %v336_v54, %v287_v57  ;;  %v289_v6 = vadd.f32 %v265_v59, %v192_v58 }
  0x5c   : > { %v194_v7 = vunpack.c.h.bf16 %v837_v55  ;;  %v267_v8 = vunpack.c.l.bf16 %v814_v61  ;;  %v363_v11 = vadd.f32 %v339_v63, %v290_v62  ;;  %v341_v12 = vunpack.c.l.bf16 %v839_v4 }
  0x5d   : > { %390 = vadd.xlane.f32.xlu1 %v355_v24  ;;  %v292_v13 = vadd.f32 %v268_v3, %v195_v2  ;;  %v340_v14 = vunpack.c.h.bf16 %v814_v61  ;;  %v197_v15 = vunpack.c.l.bf16 %v173_v9  ;;  %v270_v16 = vunpack.c.h.bf16 %v173_v9 }
  0x5e   : > { %388 = vadd.xlane.f32.xlu0 %v354_v30  ;;  %v362_v17 = vadd.f32 %v338_v1, %v289_v6  ;;  %v291_v18 = vadd.f32 %v267_v8, %v194_v7  ;;  %v196_v19 = vunpack.c.h.bf16 %v839_v4  ;;  %v269_v20 = vunpack.c.l.bf16 %v816_v10 }
  0x5f   : > { %v365_v21 = vadd.f32 %v341_v12, %v292_v13  ;;  %v294_v22 = vadd.f32 %v270_v16, %v197_v15  ;;  %v343_v23 = vunpack.c.h.bf16 %v1216_v29  ;;  %v342_v26 = vunpack.c.h.bf16 %v816_v10 }
  0x60   : > { %v364_v24 = vadd.f32 %v340_v14, %v291_v18  ;;  %v293_v25 = vadd.f32 %v269_v20, %v196_v19 }
  0x61   : > { %394 = vadd.xlane.f32.xlu1 %v357_v36  ;;  %v367_v27 = vadd.f32 %v343_v23, %v294_v22 }
  0x62   : > { %392 = vadd.xlane.f32.xlu0 %v356_v43  ;;  %v366_v28 = vadd.f32 %v342_v26, %v293_v25 }
  0x65   : > { %398 = vadd.xlane.f32.xlu1 %v359_v51 }
  0x66   : > { %396 = vadd.xlane.f32.xlu0 %v358_v56 }
  0x69   : > { %402 = vadd.xlane.f32.xlu1 %v361_v0 }
  0x6a   : > { %400 = vadd.xlane.f32.xlu0 %v360_v5 }
  0x6d   : > { %406 = vadd.xlane.f32.xlu1 %v363_v11 }
  0x6e   : > { %404 = vadd.xlane.f32.xlu0 %v362_v17 }
  0x71   : > { %410 = vadd.xlane.f32.xlu1 %v365_v21 }
  0x72   : > { %408 = vadd.xlane.f32.xlu0 %v364_v24 }
  0x75   : > { %414 = vadd.xlane.f32.xlu1 %v367_v27 }
  0x76   : > { %412 = vadd.xlane.f32.xlu0 %v366_v28 }
  0xd6   : > { %v373_v30 = vpop.xlane.xlu1 %372 }
  0xd7   : > { %v418_v31 = vmul.f32 0.0026041667, %v373_v30  ;;  %v369_v32 = vpop.xlane.xlu0 %368 }
  0xd8   : > { %v416_v33 = vmul.f32 0.0026041667, %v369_v32 }
  0xd9   : > { %443 = vst.msk [vmem:[%s1246_s15 + $0x10] sm:$0xff] %vm440_vm0, %v418_v31 }
  0xda   : > { %441 = vst.msk [vmem:[%s1246_s15] sm:$0xff] %vm440_vm0, %v416_v33  ;;  %v375_v29 = vpop.xlane.xlu1 %374 }
  0xdb   : > { %v419_v34 = vmul.f32 0.0026041667, %v375_v29  ;;  %v371_v35 = vpop.xlane.xlu0 %370 }
  0xdc   : > { %v417_v36 = vmul.f32 0.0026041667, %v371_v35 }
  0xdd   : > { %444 = vst.msk [vmem:[%s1246_s15 + $0x18] sm:$0xff] %vm440_vm0, %v419_v34 }
  0xde   : > { %442 = vst.msk [vmem:[%s1246_s15 + $0x8] sm:$0xff] %vm440_vm0, %v417_v36  ;;  %v379_v37 = vpop.xlane.xlu1 %378 }
  0xdf   : > { %v421_v38 = vmul.f32 0.0026041667, %v379_v37  ;;  %v377_v39 = vpop.xlane.xlu0 %376 }
  0xe0   : > { %v420_v40 = vmul.f32 0.0026041667, %v377_v39 }
  0xe1   : > { %446 = vst.msk [vmem:[%s1246_s15 + $0x28] sm:$0xff] %vm440_vm0, %v421_v38 }
  0xe2   : > { %445 = vst.msk [vmem:[%s1246_s15 + $0x20] sm:$0xff] %vm440_vm0, %v420_v40  ;;  %v383_v41 = vpop.xlane.xlu1 %382 }
  0xe3   : > { %v423_v42 = vmul.f32 0.0026041667, %v383_v41  ;;  %v381_v43 = vpop.xlane.xlu0 %380 }
  0xe4   : > { %v422_v44 = vmul.f32 0.0026041667, %v381_v43 }
  0xe5   : > { %448 = vst.msk [vmem:[%s1246_s15 + $0x38] sm:$0xff] %vm440_vm0, %v423_v42 }
  0xe6   : > { %447 = vst.msk [vmem:[%s1246_s15 + $0x30] sm:$0xff] %vm440_vm0, %v422_v44  ;;  %v387_v45 = vpop.xlane.xlu1 %386 }
  0xe7   : > { %v425_v46 = vmul.f32 0.0026041667, %v387_v45  ;;  %v385_v47 = vpop.xlane.xlu0 %384 }
  0xe8   : > { %v424_v48 = vmul.f32 0.0026041667, %v385_v47 }
  0xe9   : > { %450 = vst.msk [vmem:[%s1246_s15 + $0x48] sm:$0xff] %vm440_vm0, %v425_v46 }
  0xea   : > { %449 = vst.msk [vmem:[%s1246_s15 + $0x40] sm:$0xff] %vm440_vm0, %v424_v48  ;;  %v391_v49 = vpop.xlane.xlu1 %390 }
  0xeb   : > { %v427_v50 = vmul.f32 0.0026041667, %v391_v49  ;;  %v389_v51 = vpop.xlane.xlu0 %388 }
  0xec   : > { %v426_v52 = vmul.f32 0.0026041667, %v389_v51 }
  0xed   : > { %452 = vst.msk [vmem:[%s1246_s15 + $0x58] sm:$0xff] %vm440_vm0, %v427_v50 }
  0xee   : > { %451 = vst.msk [vmem:[%s1246_s15 + $0x50] sm:$0xff] %vm440_vm0, %v426_v52  ;;  %v395_v53 = vpop.xlane.xlu1 %394 }
  0xef   : > { %v429_v54 = vmul.f32 0.0026041667, %v395_v53  ;;  %v393_v55 = vpop.xlane.xlu0 %392 }
  0xf0   : > { %v428_v56 = vmul.f32 0.0026041667, %v393_v55 }
  0xf1   : > { %454 = vst.msk [vmem:[%s1246_s15 + $0x68] sm:$0xff] %vm440_vm0, %v429_v54 }
  0xf2   : > { %453 = vst.msk [vmem:[%s1246_s15 + $0x60] sm:$0xff] %vm440_vm0, %v428_v56  ;;  %v399_v57 = vpop.xlane.xlu1 %398 }
  0xf3   : > { %v431_v58 = vmul.f32 0.0026041667, %v399_v57  ;;  %v397_v59 = vpop.xlane.xlu0 %396 }
  0xf4   : > { %v430_v60 = vmul.f32 0.0026041667, %v397_v59 }
  0xf5   : > { %456 = vst.msk [vmem:[%s1246_s15 + $0x78] sm:$0xff] %vm440_vm0, %v431_v58 }
  0xf6   : > { %455 = vst.msk [vmem:[%s1246_s15 + $0x70] sm:$0xff] %vm440_vm0, %v430_v60  ;;  %v403_v61 = vpop.xlane.xlu1 %402 }
  0xf7   : > { %v433_v62 = vmul.f32 0.0026041667, %v403_v61  ;;  %v401_v63 = vpop.xlane.xlu0 %400 }
  0xf8   : > { %v432_v0 = vmul.f32 0.0026041667, %v401_v63 }
  0xf9   : > { %458 = vst.msk [vmem:[%s1246_s15 + $0x88] sm:$0xff] %vm440_vm0, %v433_v62 }
  0xfa   : > { %457 = vst.msk [vmem:[%s1246_s15 + $0x80] sm:$0xff] %vm440_vm0, %v432_v0  ;;  %v407_v1 = vpop.xlane.xlu1 %406 }
  0xfb   : > { %v435_v2 = vmul.f32 0.0026041667, %v407_v1  ;;  %v405_v3 = vpop.xlane.xlu0 %404 }
  0xfc   : > { %v434_v4 = vmul.f32 0.0026041667, %v405_v3 }
  0xfd   : > { %460 = vst.msk [vmem:[%s1246_s15 + $0x98] sm:$0xff] %vm440_vm0, %v435_v2 }
  0xfe   : > { %459 = vst.msk [vmem:[%s1246_s15 + $0x90] sm:$0xff] %vm440_vm0, %v434_v4  ;;  %v411_v5 = vpop.xlane.xlu1 %410 }
  0xff   : > { %v437_v6 = vmul.f32 0.0026041667, %v411_v5  ;;  %v409_v7 = vpop.xlane.xlu0 %408 }
 0x100   : > { %v436_v8 = vmul.f32 0.0026041667, %v409_v7  ;;  %471 = sbr.rel (!%p1145_p8) target bundleno = 327 (0x147), region = 32 }
 0x101   : > { %462 = vst.msk [vmem:[%s1246_s15 + $0xa8] sm:$0xff] %vm440_vm0, %v437_v6 }
 0x102   : > { %461 = vst.msk [vmem:[%s1246_s15 + $0xa0] sm:$0xff] %vm440_vm0, %v436_v8  ;;  %v415_v9 = vpop.xlane.xlu1 %414 }
 0x103   : > { %v439_v10 = vmul.f32 0.0026041667, %v415_v9  ;;  %v413_v11 = vpop.xlane.xlu0 %412 }
 0x104   : > { %v438_v12 = vmul.f32 0.0026041667, %v413_v11 }
 0x105   : > { %464 = vst.msk [vmem:[%s1246_s15 + $0xb8] sm:$0xff] %vm440_vm0, %v439_v10 }
 0x106   : > { %463 = vst.msk [vmem:[%s1246_s15 + $0xb0] sm:$0xff] %vm440_vm0, %v438_v12 }
 0x107   : > { %s1429_s26 = smov (!%p474_p7, %s473_s26), 24 }
 0x108   : > { %s842_s2 = sshll.u32 %s1429_s26, 7 }
 0x109   : > { %p845_p11 = scmp.eq.s32.totalorder %s842_s2, 0 }
 0x10a   : > { %960 = sdivrem.u32 (!%p845_p11), %s1429_s26, 24 }
 0x10b   : > { %482 = sbr.rel (%p845_p11) target bundleno = 327 (0x147), region = 36 }
 0x113   : > { %s1309_s16 = spop.drf %960 }
 0x114   : > { %p846_p8 = scmp.le.s32.totalorder %s1309_s16, 0 }
 0x115   : > { %s1418_s10 = smov (!%p846_p8), %s1303_s30  ;;  %s1419_s3 = smov (!%p846_p8), %s1246_s15 }
 0x116   : > { %738 = sbr.rel (%p846_p8) target bundleno = 298 (0x12a), region = 120  ;;  %s1318_s4 = smov (!%p846_p8), 0  }
 0x117   : > { %s1320_s5 = smov (!%p846_p8), 0  }
 0x11d LB: >> { %v592_v13 = vld [vmem:[%s1066_s3] sm:$0xff]  ;;  %v594_v14 = vld [vmem:[%s1066_s3 + $0x8] sm:$0xff]  ;;  %v596_v15 = vld [vmem:[%s1066_s3 + $0x10] sm:$0xff]  ;;  %s640_s6 = sadd.s32 1, %s1070_s4  ;;  %s586_s5 = sadd.s32 1, %s1074_s5   ;;  %s1074_s5 = sphi %s1320_s5, %s586_s5   ;;  %s1070_s4 = sphi %s1318_s4, %s1421_s4   ;;  %s1066_s3 = sphi %s1419_s3, %s645_s3   ;;  %s1062_s10 = sphi %s1418_s10, %s1420_s10  }
 0x11e   : >> { %593 = vst [vmem:[%s1062_s10] sm:$0xff] %v592_v13  ;;  %595 = vst [vmem:[%s1062_s10 + $0x8] sm:$0xff] %v594_v14  ;;  %v598_v16 = vld [vmem:[%s1066_s3 + $0x18] sm:$0xff]  ;;  %v600_v17 = vld [vmem:[%s1066_s3 + $0x20] sm:$0xff]  ;;  %p641_p6 = scmp.ge.s32.totalorder %s640_s6, %s1309_s16  ;;  %p585_p9 = scmp.ge.s32.totalorder %s586_s5, %s1309_s16 }
 0x11f   : >> { %597 = vst [vmem:[%s1062_s10 + $0x10] sm:$0xff] %v596_v15  ;;  %v602_v18 = vld [vmem:[%s1066_s3 + $0x28] sm:$0xff]  ;;  %599 = vst [vmem:[%s1062_s10 + $0x18] sm:$0xff] %v598_v16  ;;  %v604_v19 = vld [vmem:[%s1066_s3 + $0x30] sm:$0xff] }
 0x120   : >> { %601 = vst [vmem:[%s1062_s10 + $0x20] sm:$0xff] %v600_v17  ;;  %603 = vst [vmem:[%s1062_s10 + $0x28] sm:$0xff] %v602_v18  ;;  %v606_v20 = vld [vmem:[%s1066_s3 + $0x38] sm:$0xff]  ;;  %v608_v21 = vld [vmem:[%s1066_s3 + $0x40] sm:$0xff]  ;;  %s1431_s6 = smov (%p641_p6, %s640_s6), 0 }
 0x121   : >> { %605 = vst [vmem:[%s1062_s10 + $0x30] sm:$0xff] %v604_v19  ;;  %607 = vst [vmem:[%s1062_s10 + $0x38] sm:$0xff] %v606_v20  ;;  %v610_v22 = vld [vmem:[%s1066_s3 + $0x48] sm:$0xff]  ;;  %v612_v23 = vld [vmem:[%s1066_s3 + $0x50] sm:$0xff]  ;;  %s643_s12 = smul.u32 192, %s1431_s6  ;;  %s1421_s4 = smov %s1431_s6 }
 0x122   : >> { %609 = vst [vmem:[%s1062_s10 + $0x40] sm:$0xff] %v608_v21  ;;  %v614_v24 = vld [vmem:[%s1066_s3 + $0x58] sm:$0xff]  ;;  %611 = vst [vmem:[%s1062_s10 + $0x48] sm:$0xff] %v610_v22  ;;  %v616_v25 = vld [vmem:[%s1066_s3 + $0x60] sm:$0xff] }
 0x123   : >> { %613 = vst [vmem:[%s1062_s10 + $0x50] sm:$0xff] %v612_v23  ;;  %615 = vst [vmem:[%s1062_s10 + $0x58] sm:$0xff] %v614_v24  ;;  %v618_v26 = vld [vmem:[%s1066_s3 + $0x68] sm:$0xff]  ;;  %v620_v27 = vld [vmem:[%s1066_s3 + $0x70] sm:$0xff]  ;;  %s646_s13 = scalar_lea.vmem %s1303_s30, %s643_s12   ;;  %588 = sbr.rel (!%p585_p9) target bundleno = 285 (0x11d), region = 126 }
 0x124   : >> { %617 = vst [vmem:[%s1062_s10 + $0x60] sm:$0xff] %v616_v25  ;;  %619 = vst [vmem:[%s1062_s10 + $0x68] sm:$0xff] %v618_v26  ;;  %v622_v28 = vld [vmem:[%s1066_s3 + $0x78] sm:$0xff]  ;;  %v624_v30 = vld [vmem:[%s1066_s3 + $0x80] sm:$0xff] }
 0x125   : >> { %621 = vst [vmem:[%s1062_s10 + $0x70] sm:$0xff] %v620_v27  ;;  %v626_v31 = vld [vmem:[%s1066_s3 + $0x88] sm:$0xff]  ;;  %623 = vst [vmem:[%s1062_s10 + $0x78] sm:$0xff] %v622_v28  ;;  %v628_v32 = vld [vmem:[%s1066_s3 + $0x90] sm:$0xff] }
 0x126   : >> { %625 = vst [vmem:[%s1062_s10 + $0x80] sm:$0xff] %v624_v30  ;;  %627 = vst [vmem:[%s1062_s10 + $0x88] sm:$0xff] %v626_v31  ;;  %v630_v33 = vld [vmem:[%s1066_s3 + $0x98] sm:$0xff]  ;;  %v632_v29 = vld [vmem:[%s1066_s3 + $0xa0] sm:$0xff] }
 0x127   : >> { %629 = vst [vmem:[%s1062_s10 + $0x90] sm:$0xff] %v628_v32  ;;  %631 = vst [vmem:[%s1062_s10 + $0x98] sm:$0xff] %v630_v33  ;;  %v634_v34 = vld [vmem:[%s1066_s3 + $0xa8] sm:$0xff]  ;;  %v636_v35 = vld [vmem:[%s1066_s3 + $0xb0] sm:$0xff] }
 0x128   : >> { %633 = vst [vmem:[%s1062_s10 + $0xa0] sm:$0xff] %v632_v29  ;;  %v638_v36 = vld [vmem:[%s1066_s3 + $0xb8] sm:$0xff]  ;;  %s645_s3 = scalar_lea.vmem %s1246_s15, %s643_s12 [#allocation4]   ;;  %635 = vst [vmem:[%s1062_s10 + $0xa8] sm:$0xff] %v634_v34 }
 0x129   : >> { %637 = vst [vmem:[%s1062_s10 + $0xb0] sm:$0xff] %v636_v35  ;;  %639 = vst [vmem:[%s1062_s10 + $0xb8] sm:$0xff] %v638_v36  ;;  %s1420_s10 = smov %s646_s13 }
 0x12a PF: > { %962 = sdivrem.u32 %s1429_s26, 24 }
 0x12b   : > { %s847_s17 = smul.u32 192, %s1309_s16 }
 0x12d   : > { %s651_s18 = scalar_lea.vmem %s1246_s15, %s847_s17 [#allocation4]   ;;  %s653_s19 = scalar_lea.vmem %s1303_s30, %s847_s17  }
 0x133   : > { %s963_s20 = spop.drf %962 }
 0x134   : > { %p849_p10 = scmp.le.s32.totalorder %s963_s20, 0 }
 0x135   : > { %s1076_s22 = smov (!%p849_p10), %s653_s19   ;;  %s1080_s24 = smov (!%p849_p10), %s651_s18  }
 0x136   : > { %752 = sbr.rel (%p849_p10) target bundleno = 327 (0x147), region = 131  ;;  %s1084_s25 = smov (!%p849_p10), 0  }
 0x137   : > { %s1088_s27 = smov (!%p849_p10), 0  }
 0x13d LB: >> { %v663_v37 = vld [vmem:[%s1082_s24] sm:$0xff]  ;;  %s665_s9 = sadd.s32 1, %s1086_s25  ;;  %s657_s27 = sadd.s32 1, %s1090_s27   ;;  %s1090_s27 = sphi %s1088_s27, %s657_s27   ;;  %s1086_s25 = sphi %s1084_s25, %s1085_s25   ;;  %s1082_s24 = sphi %s1080_s24, %s670_s24   ;;  %s1078_s22 = sphi %s1076_s22, %s671_s22  }
 0x13e   : >> { %664 = vst [vmem:[%s1078_s22] sm:$0xff] %v663_v37  ;;  %p666_p12 = scmp.ge.s32.totalorder %s665_s9, %s963_s20  ;;  %p656_p13 = scmp.ge.s32.totalorder %s657_s27, %s963_s20 }
 0x140   : >> { %s1433_s9 = smov (%p666_p12, %s665_s9), 0  ;;  %659 = sbr.rel (!%p656_p13) target bundleno = 317 (0x13d), region = 137 }
 0x141   : >> { %s850_s15 = sshll.u32 %s1433_s9, 3  ;;  %s1085_s25 = smov %s1433_s9  }
 0x142   : >> { %s670_s24 = scalar_lea.vmem %s651_s18, %s850_s15 [#allocation4]   ;;  %s671_s22 = scalar_lea.vmem %s653_s19, %s850_s15  }
 0x147 PF: > { %p11_p1 = scmp.ge.s32.totalorder %s1127_s11, 8   ;;  %s1422_s6 = smov %s1050_s7 }
 0x148   : > { %s1423_s7 = smov %s1054_s8  ;;  %s1424_s8 = smov %s1137_s14 }
 0x149   : > { %s1425_s9 = smov %s1127_s11  ;;  %13 = sbr.rel (!%p11_p1) target bundleno = 3 (0x3), region = 148 }
 0x150   :  { %687 = vsyncpa [#allocation3], 1 }
 0x151   :  { %689 = vsyncpa [#allocation3 + $0x1], 1 }

</bundles_post_ra>
